<compile_context>
chip_gen: v7x
topology: tpu7x:2x2x1
jax: 0.10.0
libtpu: 0.0.40
codegen_flags: <defaults>
</compile_context>

<pallas_src>
import functools

import jax
import jax.numpy as jnp
from jax.experimental import pallas as pl
from jax.experimental.pallas import tpu as pltpu

NEG_SLOPE = 0.01   # PyTorch nn.LeakyReLU default negative_slope
BN_EPS = 1e-5      # PyTorch nn.BatchNorm1d default eps
_LANE = 128        # lane padding; bump to 256 only if a bundle shows MXU-bound on v6e/v7x
_SUBLANE = 8
_MAX_TM = 512      # batch-tile upper bound (review: 256-512 is the sweet spot)


def _round_up(n, m):
    return ((n + m - 1) // m) * m


def _cdiv(a, b):
    return -(-a // b)


def _leaky_relu(x):
    # max(y, slope*y) == LeakyReLU(y) for 0 < slope < 1 (2 VALU ops).
    return jnp.maximum(x, NEG_SLOPE * x)


# ---------------- Capability probes (run once, cached) ---------------------------

@functools.lru_cache(maxsize=None)
def _single_buffer_mode():
    """Return pl.Buffered(1) if pipeline_mode is supported here, else None.

    Block-resident weights/biases have a constant index_map, so double-buffering
    them only wastes VMEM; single-buffering halves their footprint."""
    try:
        def probe(x_ref, w_ref, o_ref):
            o_ref[...] = x_ref[...] + w_ref[...]

        f = pl.pallas_call(
            probe,
            out_shape=jax.ShapeDtypeStruct((16, 128), jnp.float32),
            grid=(2,),
            in_specs=[pl.BlockSpec((8, 128), lambda i: (i, 0)),
                      pl.BlockSpec((8, 128), lambda i: (0, 0),
                                   pipeline_mode=pl.Buffered(1))],
            out_specs=pl.BlockSpec((8, 128), lambda i: (i, 0)),
        )
        y = jax.block_until_ready(f(jnp.zeros((16, 128), jnp.float32),
                                    jnp.ones((8, 128), jnp.float32)))
        return pl.Buffered(1) if bool(jnp.allclose(y, 1.0)) else None
    except Exception:
        return None   # fall back to default double-buffered resident blocks


@functools.lru_cache(maxsize=None)
def _vmem_budget_bytes():
    """Generation-aware VMEM budget (with headroom for compiler scratch)."""
    try:
        cap = int(pltpu.get_tpu_info().vmem_capacity_bytes)
    except Exception:
        cap = 64 * 1024 * 1024                      # unknown -> be conservative
    if cap >= 128 * 1024 * 1024:                    # v5e / v6e (128 MiB physical)
        return 96 * 1024 * 1024
    return 48 * 1024 * 1024                         # v7x (64 MiB per TensorCore)


# ---------------- Fused kernel ----------------------------------------------------

def _make_fused_mlp_kernel(num_act_layers):
    """Kernel refs: x, (w0, b0), ..., (w_{L-1}, b_{L-1}), w_out, o."""

    def kernel(*refs):
        x_ref = refs[0]
        w_out_ref = refs[1 + 2 * num_act_layers]
        o_ref = refs[2 + 2 * num_act_layers]

        h = x_ref[...]
        for i in range(num_act_layers):
            w_ref = refs[1 + 2 * i]
            b_ref = refs[2 + 2 * i]
            # MXU matmul in the weights' dtype (f32 or bf16), f32 accumulation;
            # bias + LeakyReLU (dropout == identity in eval) stay in f32.
            y = jnp.dot(h.astype(w_ref.dtype), w_ref[...],
                        preferred_element_type=jnp.float32)
            h = _leaky_relu(y + b_ref[...])

        o_ref[...] = jnp.dot(h.astype(w_out_ref.dtype), w_out_ref[...],
                             preferred_element_type=jnp.float32).astype(o_ref.dtype)

    return kernel


# ---------------- One-time operand preparation (outside the per-call path) --------

def prepare_mlp_operands(params, compute_dtype=jnp.bfloat16):
    """Fold eval-mode BatchNorm into the following Linear (f32), zero-pad feature
    dims to lane multiples, and cast matmul operands to the compute dtype.
    Call ONCE; the result is reused by every mlp_forward() call."""
    _single_buffer_mode()   # warm the pipeline_mode probe outside any jit trace

    layers = [(params["w_in"], params["b_in"].reshape(1, -1))]
    for l in params["hidden"]:
        scale = l["gamma"] * jax.lax.rsqrt(l["var"] + BN_EPS)        # (1, d_prev)
        w = scale.reshape(-1, 1) * l["w"]                            # (d_prev, d_next)
        b = l["b"] + (l["beta"] - l["mean"] * scale) @ l["w"]        # (1, d_next)
        layers.append((w, b.reshape(1, -1)))

    operands = []
    for idx, (w, b) in enumerate(layers):
        # First layer keeps its true K (= input_dim) so x needs NO wrapper-side
        # feature pad/copy; later layers' K matches the previous layer's padded N
        # (whose padded columns are exactly zero after bias+LeakyReLU).
        kp = w.shape[0] if idx == 0 else _round_up(w.shape[0], _LANE)
        np_ = _round_up(w.shape[1], _LANE)
        w_pad = jnp.zeros((kp, np_), jnp.float32).at[:w.shape[0], :w.shape[1]].set(w)
        b_pad = jnp.zeros((1, np_), jnp.float32).at[:, :b.shape[1]].set(b)
        operands.append(w_pad.astype(compute_dtype))
        operands.append(b_pad)                                       # bias stays f32

    w_out = params["w_out"]
    kp = _round_up(w_out.shape[0], _LANE)
    np_ = _round_up(w_out.shape[1], _LANE)
    w_out_pad = (jnp.zeros((kp, np_), jnp.float32)
                 .at[:w_out.shape[0], :w_out.shape[1]].set(w_out))
    operands.append(w_out_pad.astype(compute_dtype))

    operands = jax.block_until_ready(tuple(operands))
    return {"operands": operands, "out_dim": int(params["w_out"].shape[1])}


# ---------------- Forward ----------------------------------------------------------

@functools.partial(jax.jit, static_argnames=("out_dim",))
def _mlp_forward_impl(x, operands, out_dim):
    B, Fin = x.shape
    num_act_layers = (len(operands) - 1) // 2
    assert operands[0].shape[0] == Fin, "x feature dim must match the first Linear"
    out_pad = operands[-1].shape[1]
    widths = [operands[2 * i].shape[1] for i in range(num_act_layers)] + [out_pad]

    mode = _single_buffer_mode()
    wbuf = 1 if mode is not None else 2
    budget = _vmem_budget_bytes()

    # --- Explicit VMEM accounting: resident weights + per-batch-row working set ---
    resident = wbuf * sum(int(op.size) * op.dtype.itemsize for op in operands)
    per_row = (2 * Fin * x.dtype.itemsize           # double-buffered x tile
               + 2 * out_pad * 4                    # double-buffered f32 out tile
               + 8 * sum(widths))                   # live f32 activations + casts (generous)
    avail = budget - resident - (2 * 1024 * 1024)   # slack for compiler scratch
    tm = max(_SUBLANE, min(_MAX_TM,
                           (avail // per_row) // _SUBLANE * _SUBLANE,
                           _round_up(B, _SUBLANE)))
    # TODO(synk): if `avail` goes negative the largest layer should be streamed
    # (extra grid axis over its N) instead of kept VMEM-resident.

    # Guarantee >= 2 batch grid steps so dimension_semantics=("parallel",) can
    # split work across v7x's two TensorCores (cheap no-op on v5e/v6e).
    if B >= 2 * _SUBLANE and _cdiv(B, tm) < 2:
        tm = _round_up(_cdiv(B, 2), _SUBLANE)
    grid = (_cdiv(B, tm),)

    def _resident_spec(shape):
        if mode is None:
            return pl.BlockSpec(shape, lambda i: (0, 0))
        return pl.BlockSpec(shape, lambda i: (0, 0), pipeline_mode=mode)

    # x: (tm, Fin) block; no wrapper-side pad -- partial last block is masked.
    in_specs = [pl.BlockSpec((tm, Fin), lambda i: (i, 0))]
    for li in range(num_act_layers):
        in_specs.append(_resident_spec(operands[2 * li].shape))       # weight
        in_specs.append(_resident_spec(operands[2 * li + 1].shape))   # bias
    in_specs.append(_resident_spec(operands[-1].shape))               # output weight
    out_specs = pl.BlockSpec((tm, out_pad), lambda i: (i, 0))

    y_pad = pl.pallas_call(
        _make_fused_mlp_kernel(num_act_layers),
        out_shape=jax.ShapeDtypeStruct((B, out_pad), jnp.float32),
        grid=grid,
        in_specs=in_specs,
        out_specs=out_specs,
        compiler_params=pltpu.CompilerParams(
            dimension_semantics=("parallel",),   # batch tiles -> both TCs on v7x
            vmem_limit_bytes=budget,
        ),
    )(x, *operands)

    # Lane-padded result; slice to the logical width (consumers that can take the
    # padded slab should use y_pad directly and slice lazily).
    return y_pad[:, :out_dim]


def mlp_forward(x, prep):
    """prep = prepare_mlp_operands(params, ...), computed once."""
    return _mlp_forward_impl(x, prep["operands"], out_dim=prep["out_dim"])


# ---------------- Parameter construction -------------------------------------------

def init_params(key, input_dim, hidden_dims, output_dim):
    params = {}
    k = key

    def nk():
        nonlocal k
        k, sub = jax.random.split(k)
        return sub

    # PyTorch Linear stores (out, in); we keep (in, out) for x @ W.
    params["w_in"] = jax.random.normal(nk(), (input_dim, hidden_dims[0]),
                                       jnp.float32) * 0.1
    params["b_in"] = jax.random.normal(nk(), (1, hidden_dims[0]), jnp.float32) * 0.1

    hidden = []
    for i in range(1, len(hidden_dims)):
        d_prev, d_next = hidden_dims[i - 1], hidden_dims[i]
        hidden.append({
            "gamma": jax.random.normal(nk(), (1, d_prev), jnp.float32) * 0.1 + 1.0,
            "beta":  jax.random.normal(nk(), (1, d_prev), jnp.float32) * 0.1,
            "mean":  jax.random.normal(nk(), (1, d_prev), jnp.float32) * 0.1,
            "var":   jax.random.uniform(nk(), (1, d_prev), jnp.float32,
                                        minval=0.5, maxval=1.5),
            "w":     jax.random.normal(nk(), (d_prev, d_next), jnp.float32) * 0.1,
            "b":     jax.random.normal(nk(), (1, d_next), jnp.float32) * 0.1,
        })
    params["hidden"] = hidden

    params["w_out"] = jax.random.normal(nk(), (hidden_dims[-1], output_dim),
                                        jnp.float32) * 0.1
    return params


# ---------------- Reference (plain JAX, unfolded BN) --------------------------------

def mlp_reference(x, params):
    hp = jax.lax.Precision.HIGHEST
    y = jnp.maximum(z := jnp.dot(x, params["w_in"], precision=hp) + params["b_in"],
                    NEG_SLOPE * z)
    for l in params["hidden"]:
        yn = (y - l["mean"]) / jnp.sqrt(l["var"] + BN_EPS) * l["gamma"] + l["beta"]
        z = jnp.dot(yn, l["w"], precision=hp) + l["b"]
        y = jnp.maximum(z, NEG_SLOPE * z)
    return jnp.dot(y, params["w_out"], precision=hp)


if __name__ == "__main__":
    key = jax.random.PRNGKey(0)
    k_x, k_p, k_x2, k_p2 = jax.random.split(key, 4)

    # ---- Test 1: small shapes, single grid step ----
    batch, input_dim, hidden_dims, output_dim = 8, 16, [32, 32], 8
    x = jax.random.normal(k_x, (batch, input_dim), jnp.float32)
    params = init_params(k_p, input_dim, hidden_dims, output_dim)
    ref = mlp_reference(x, params)

    # f32 compute path: tight tolerance (BN-fold reassociation only).
    prep_f32 = prepare_mlp_operands(params, compute_dtype=jnp.float32)
    out_f32 = jax.block_until_ready(mlp_forward(x, prep_f32))
    assert out_f32.shape == (batch, output_dim)
    assert jnp.allclose(out_f32, ref, atol=5e-4, rtol=5e-4)

    # Default bf16 MXU-operand path (f32 accumulation): looser tolerance.
    prep_bf16 = prepare_mlp_operands(params)
    out_bf16 = jax.block_until_ready(mlp_forward(x, prep_bf16))
    assert out_bf16.shape == (batch, output_dim)
    assert jnp.allclose(out_bf16, ref, atol=2.5e-2, rtol=2.5e-2)

    # ---- Test 2: unaligned dims, multi-step batch grid with a partial last block ----
    batch2, input_dim2, hidden_dims2, output_dim2 = 37, 24, [48, 24], 5
    x2 = jax.random.normal(k_x2, (batch2, input_dim2), jnp.float32)
    params2 = init_params(k_p2, input_dim2, hidden_dims2, output_dim2)
    ref2 = mlp_reference(x2, params2)
    out2 = jax.block_until_ready(mlp_forward(x2, prepare_mlp_operands(params2)))
    assert out2.shape == (batch2, output_dim2)
    assert jnp.allclose(out2, ref2, atol=2.5e-2, rtol=2.5e-2)

    print("KERNEL_OK")
</pallas_src>

<mosaic_0001>
module attributes {stable_mosaic.version = 11 : i64} {
  func.func @probe(%arg0: i32, %arg1: memref<8x128xf32, #tpu.memory_space<vmem>>, %arg2: memref<8x128xf32, #tpu.memory_space<vmem>>, %arg3: memref<8x128xf32, #tpu.memory_space<vmem>>) attributes {dimension_semantics = [#tpu.dimension_semantics<arbitrary>], iteration_bounds = array<i64: 2>, scalar_prefetch = 0 : i64, scratch_operands = 0 : i64, tpu.core_type = #tpu.core_type<tc>, window_params = [{transform_indices = @transform_0, window_bounds = array<i64: 8, 128>}, {pipeline_mode = #tpu.pipeline_mode<synchronous>, transform_indices = @transform_1, window_bounds = array<i64: 8, 128>}, {transform_indices = @transform_2, window_bounds = array<i64: 8, 128>}]} {
    %c0 = arith.constant 0 : index
    %c0_0 = arith.constant 0 : index
    %0 = vector.load %arg1[%c0, %c0_0] : memref<8x128xf32, #tpu.memory_space<vmem>>, vector<8x128xf32>
    %c0_1 = arith.constant 0 : index
    %c0_2 = arith.constant 0 : index
    %1 = vector.load %arg2[%c0_1, %c0_2] : memref<8x128xf32, #tpu.memory_space<vmem>>, vector<8x128xf32>
    %2 = arith.addf %0, %1 : vector<8x128xf32>
    %c0_3 = arith.constant 0 : index
    %c0_4 = arith.constant 0 : index
    %3 = vector.load %arg3[%c0_3, %c0_4] : memref<8x128xf32, #tpu.memory_space<vmem>>, vector<8x128xf32>
    tpu.vector_store %arg3[%c0_3, %c0_4], %2 {strides = array<i32>} : memref<8x128xf32, #tpu.memory_space<vmem>>, vector<8x128xf32>,
    return
  }
  func.func @transform_0(%arg0: i32) -> (i32, i32) {
    %c0_i32 = arith.constant 0 : i32
    %c0_i32_0 = arith.constant 0 : i32
    return %arg0, %c0_i32 : i32, i32
  }
  func.func @transform_1(%arg0: i32) -> (i32, i32) {
    %c0_i32 = arith.constant 0 : i32
    %c0_i32_0 = arith.constant 0 : i32
    %c0_i32_1 = arith.constant 0 : i32
    return %c0_i32, %c0_i32_0 : i32, i32
  }
  func.func @transform_2(%arg0: i32) -> (i32, i32) {
    %c0_i32 = arith.constant 0 : i32
    %c0_i32_0 = arith.constant 0 : i32
    return %arg0, %c0_i32 : i32, i32
  }
}

module attributes {stable_mosaic.version = 11 : i64} {
  func.func @kernel(%arg0: i32, %arg1: memref<8x16xf32, #tpu.memory_space<vmem>>, %arg2: memref<16x128xf32, #tpu.memory_space<vmem>>, %arg3: memref<1x128xf32, #tpu.memory_space<vmem>>, %arg4: memref<128x128xf32, #tpu.memory_space<vmem>>, %arg5: memref<1x128xf32, #tpu.memory_space<vmem>>, %arg6: memref<128x128xf32, #tpu.memory_space<vmem>>, %arg7: memref<8x128xf32, #tpu.memory_space<vmem>>) attributes {dimension_semantics = [#tpu.dimension_semantics<parallel>], iteration_bounds = array<i64: 1>, scalar_prefetch = 0 : i64, scratch_operands = 0 : i64, tpu.core_type = #tpu.core_type<tc>, window_params = [{transform_indices = @transform_0, window_bounds = array<i64: 8, 16>}, {pipeline_mode = #tpu.pipeline_mode<synchronous>, transform_indices = @transform_1, window_bounds = array<i64: 16, 128>}, {pipeline_mode = #tpu.pipeline_mode<synchronous>, transform_indices = @transform_2, window_bounds = array<i64: 1, 128>}, {pipeline_mode = #tpu.pipeline_mode<synchronous>, transform_indices = @transform_3, window_bounds = array<i64: 128, 128>}, {pipeline_mode = #tpu.pipeline_mode<synchronous>, transform_indices = @transform_4, window_bounds = array<i64: 1, 128>}, {pipeline_mode = #tpu.pipeline_mode<synchronous>, transform_indices = @transform_5, window_bounds = array<i64: 128, 128>}, {transform_indices = @transform_6, window_bounds = array<i64: 8, 128>}]} {
    %c0 = arith.constant 0 : index
    %c0_0 = arith.constant 0 : index
    %0 = vector.load %arg1[%c0, %c0_0] : memref<8x16xf32, #tpu.memory_space<vmem>>, vector<8x16xf32>
    %c0_1 = arith.constant 0 : index
    %c0_2 = arith.constant 0 : index
    %1 = vector.load %arg2[%c0_1, %c0_2] : memref<16x128xf32, #tpu.memory_space<vmem>>, vector<16x128xf32>
    %cst = arith.constant dense<0.000000e+00> : vector<8x128xf32>
    %2 = tpu.matmul %0, %1, %cst {dimension_numbers = #tpu.dot_dimension_numbers<[1], [0], [0], [1], [0, 0, 1, 1], [], []>} : vector<8x16xf32>, vector<16x128xf32>, vector<8x128xf32> -> vector<8x128xf32>
    %c0_3 = arith.constant 0 : index
    %c0_4 = arith.constant 0 : index
    %3 = vector.load %arg3[%c0_3, %c0_4] : memref<1x128xf32, #tpu.memory_space<vmem>>, vector<1x128xf32>
    %4 = vector.broadcast %3 : vector<1x128xf32> to vector<8x128xf32>
    %5 = arith.addf %2, %4 : vector<8x128xf32>
    %cst_5 = arith.constant 0.00999999977 : f32
    %6 = vector.broadcast %cst_5 : f32 to vector<8x128xf32>
    %7 = arith.mulf %6, %5 : vector<8x128xf32>
    %8 = arith.maximumf %5, %7 : vector<8x128xf32>
    %c0_6 = arith.constant 0 : index
    %c0_7 = arith.constant 0 : index
    %9 = vector.load %arg4[%c0_6, %c0_7] : memref<128x128xf32, #tpu.memory_space<vmem>>, vector<128x128xf32>
    %cst_8 = arith.constant dense<0.000000e+00> : vector<8x128xf32>
    %10 = tpu.matmul %8, %9, %cst_8 {dimension_numbers = #tpu.dot_dimension_numbers<[1], [0], [0], [1], [0, 0, 1, 1], [], []>} : vector<8x128xf32>, vector<128x128xf32>, vector<8x128xf32> -> vector<8x128xf32>
    %c0_9 = arith.constant 0 : index
    %c0_10 = arith.constant 0 : index
    %11 = vector.load %arg5[%c0_9, %c0_10] : memref<1x128xf32, #tpu.memory_space<vmem>>, vector<1x128xf32>
    %12 = vector.broadcast %11 : vector<1x128xf32> to vector<8x128xf32>
    %13 = arith.addf %10, %12 : vector<8x128xf32>
    %cst_11 = arith.constant 0.00999999977 : f32
    %14 = vector.broadcast %cst_11 : f32 to vector<8x128xf32>
    %15 = arith.mulf %14, %13 : vector<8x128xf32>
    %16 = arith.maximumf %13, %15 : vector<8x128xf32>
    %c0_12 = arith.constant 0 : index
    %c0_13 = arith.constant 0 : index
    %17 = vector.load %arg6[%c0_12, %c0_13] : memref<128x128xf32, #tpu.memory_space<vmem>>, vector<128x128xf32>
    %cst_14 = arith.constant dense<0.000000e+00> : vector<8x128xf32>
    %18 = tpu.matmul %16, %17, %cst_14 {dimension_numbers = #tpu.dot_dimension_numbers<[1], [0], [0], [1], [0, 0, 1, 1], [], []>} : vector<8x128xf32>, vector<128x128xf32>, vector<8x128xf32> -> vector<8x128xf32>
    %c0_15 = arith.constant 0 : index
    %c0_16 = arith.constant 0 : index
    %19 = vector.load %arg7[%c0_15, %c0_16] : memref<8x128xf32, #tpu.memory_space<vmem>>, vector<8x128xf32>
    tpu.vector_store %arg7[%c0_15, %c0_16], %18 {strides = array<i32>} : memref<8x128xf32, #tpu.memory_space<vmem>>, vector<8x128xf32>,
    return
  }
  func.func @transform_0(%arg0: i32) -> (i32, i32) {
    %c0_i32 = arith.constant 0 : i32
    %c0_i32_0 = arith.constant 0 : i32
    return %arg0, %c0_i32 : i32, i32
  }
  func.func @transform_1(%arg0: i32) -> (i32, i32) {
    %c0_i32 = arith.constant 0 : i32
    %c0_i32_0 = arith.constant 0 : i32
    %c0_i32_1 = arith.constant 0 : i32
    return %c0_i32, %c0_i32_0 : i32, i32
  }
  func.func @transform_2(%arg0: i32) -> (i32, i32) {
    %c0_i32 = arith.constant 0 : i32
    %c0_i32_0 = arith.constant 0 : i32
    %c0_i32_1 = arith.constant 0 : i32
    return %c0_i32, %c0_i32_0 : i32, i32
  }
  func.func @transform_3(%arg0: i32) -> (i32, i32) {
    %c0_i32 = arith.constant 0 : i32
    %c0_i32_0 = arith.constant 0 : i32
    %c0_i32_1 = arith.constant 0 : i32
    return %c0_i32, %c0_i32_0 : i32, i32
  }
  func.func @transform_4(%arg0: i32) -> (i32, i32) {
    %c0_i32 = arith.constant 0 : i32
    %c0_i32_0 = arith.constant 0 : i32
    %c0_i32_1 = arith.constant 0 : i32
    return %c0_i32, %c0_i32_0 : i32, i32
  }
  func.func @transform_5(%arg0: i32) -> (i32, i32) {
    %c0_i32 = arith.constant 0 : i32
    %c0_i32_0 = arith.constant 0 : i32
    %c0_i32_1 = arith.constant 0 : i32
    return %c0_i32, %c0_i32_0 : i32, i32
  }
  func.func @transform_6(%arg0: i32) -> (i32, i32) {
    %c0_i32 = arith.constant 0 : i32
    %c0_i32_0 = arith.constant 0 : i32
    return %arg0, %c0_i32 : i32, i32
  }
}

</mosaic_0001>

<bundles_post_ra>
// kernel: tpu_custom_call.1
= control target key start
LH: loop header
LB: loop body
LE: loop exit
PB: predicated region body
PF: predicated region fallthrough
CT: control target
= control target key end

     0   :  { %7 = vsyncpa [#allocation3], 0  ;;  %s690_s0 = inlined_call_operand.hbm [shape: f32[16,128], index: 0, kind: input, shape index: {}]   ;;  %s691_s1 = inlined_call_operand.hbm [shape: f32[8,128], index: 1, kind: input, shape index: {}]   ;;  %s692_s2 = inlined_call_operand.hbm [shape: f32[16,128], index: 2, kind: output, shape index: {}]  }
   0x1   :  { %9 = vsyncpa [#allocation3 + $0x1], 0 }
   0x2   :  { %10 = vsyncpa [#allocation6], 0 }
   0x3   :  { %11 = vsyncpa [#allocation4], 0 }
   0x4   :  { %13 = vsyncpa [#allocation4 + $0x1], 0  ;;  %s489_s9 = smov 0   ;;  %s491_s10 = smov 0  }
   0x5   :  { %s493_s11 = smov 0   ;;  %s495_s12 = smov 0  }
   0x6 LB: > { %s510_s13 = sadd.s32 4294967295, %s469_s12   ;;  %s270_s14 = sadd.s32 4294967294, %s469_s12   ;;  %s469_s12 = sphi %s495_s12, %s716_s12   ;;  %s465_s11 = sphi %s493_s11, %s715_s11   ;;  %s461_s10 = sphi %s491_s10, %s714_s10   ;;  %s457_s9 = sphi %s489_s9, %s713_s9  }
   0x7   : > { %p39_p0 = scmp.ne.s32.totalorder %s461_s10, %s457_s9  ;;  %p693_p1 = scmp.eq.s32.totalorder %s510_s13, 0 }
   0x8   : > { %p90_p3 = scmp.eq.s32.totalorder %s270_s14, 1  ;;  %p271_p5 = scmp.ge.s32.totalorder %s469_s12, 1 }
   0x9   : > { %p519_p4 = por %p693_p1, %p39_p0  ;;  %p97_p7 = scmp.lt.s32.totalorder %s469_s12, 3 }
   0xa   : > { %p524_p6 = por %p90_p3, %p39_p0  ;;  %s471_s18 = smov [#allocation5]  }
   0xb   : > { %s696_s15 = scalar_select %p519_p4, 1, 0 }
   0xc   : > { %s697_s16 = scalar_select %p524_p6, 1, 0 }
   0xd   : > { %p529_p8 = pnand %p271_p5, %p97_p7  ;;  %s110_s19 = sshll.u32 %s471_s18, 4  ;;  %s111_s19 = int_to_ptr.vmem [resolvable:$true] %s110_s19 }
   0xe   : > { %s537_s20 = sadd.s32 1, %s469_s12   ;;  %s26_s24 = sadd.s32 1, %s465_s11 }
   0xf   : > { %s698_s17 = scalar_select %p529_p8, 1, 0 }
  0x10   : > { %p292_p10 = pneg %p529_p8  ;;  %s23_s22 = ssub.s32 %s469_s12, %s537_s20 }
  0x11   : > { %p547_p12 = scmp.eq.s32.totalorder %s23_s22, 0  ;;  %s341_s27 = scalar_lea.hbm %s691_s1, 128 }
  0x12   : > { %p541_p11 = pnand %p292_p10, %p693_p1  ;;  %p342_p0 = scmp.ne.s32.totalorder %s691_s1, %s341_s27 }
  0x13   : > { %s700_s23 = scalar_select %p547_p12, 1, 0 }
  0x14   : > { %p343_p3 = pneg %p541_p11  ;;  %p348_p10 = scmp.lt.u32.totalorder %s341_s27, %s691_s1 }
  0x16   : > { %p344_p5 = pnand %p343_p3, %p342_p0 }
  0x18   : > { %p345_p7 = pneg %p344_p5 }
  0x1a   : > { %p350_p9 = pnand %p348_p10, %p345_p7 }
  0x1c   : > { %353 = shalt.err (!%p350_p9)
}
  0x1d   : > { %s354_s4 = scalar_lea.vmem %s111_s19, 128  ;;  %p362_p6 = scmp.lt.s32.totalorder %s111_s19, %s111_s19 }
  0x1e   : > { %p355_p1 = scmp.ne.s32.totalorder %s111_s19, %s354_s4  ;;  %p363_p4 = scmp.lt.s32.totalorder %s354_s4, %s354_s4 }
  0x20   : > { %p357_p2 = pnand %p355_p1, %p343_p3  ;;  %p364_p8 = por %p363_p4, %p362_p6 }
  0x22   : > { %p358_p13 = pneg %p357_p2 }
  0x24   : > { %p365_p12 = pnand %p364_p8, %p358_p13 }
  0x26   : > { %368 = shalt.err (!%p365_p12)
}
  0x27   : > { %295 = dma.hbm_to_vmem [thread:$0]  (!%p541_p11), %s691_s1, 128, %s111_s19, [#allocation6]  }
  0x28   : > { %p701_p1 = scmp.ne.s32.totalorder %s700_s23, 0  ;;  %p34_p2 = scmp.eq.s32.totalorder %s469_s12, 0 }
  0x29   : > { %p702_p4 = scmp.ne.s32.totalorder %s465_s11, %s461_s10  ;;  %p703_p6 = scmp.eq.s32.totalorder %s510_s13, 1 }
  0x2a   : > { %s573_s7 = scalar_select %p701_p1, %s465_s11, %s26_s24  }
  0x2b   : > { %p581_p8 = por %p703_p6, %p702_p4  ;;  %p305_p9 = scmp.lt.s32.totalorder %s469_s12, 2 }
  0x2c   : > { %s121_s14 = sand.u32 1, %s465_s11   ;;  %p705_p12 = pmov %p702_p4 }
  0x2d   : > { %s274_s18 = sshll.u32 %s121_s14, 3  ;;  %s275_s21 = sshll.u32 %s469_s12, 7 }
  0x2e   : > { %p35_p13 = por %p34_p2, %p705_p12  ;;  %s594_s19 = scalar_lea.hbm %s690_s0, %s275_s21 }
  0x2f   : > { %s125_s23 = scalar_lea.vmem [#allocation2], %s274_s18  ;;  %s122_s27 = scalar_lea.sflag [#allocation3], %s121_s14 }
  0x30   : > { %s132_s24 = sshll.u32 %s125_s23, 4  ;;  %p596_p11 = pnand %p305_p9, %p35_p13  ;;  %s600_s24 = int_to_ptr.vmem [resolvable:$true] %s132_s24 }
  0x31   : > { %s369_s28 = scalar_lea.hbm %s594_s19, 128  ;;  %s374_s3 = scalar_lea.hbm %s690_s0, 256 }
  0x32   : > { %p370_p0 = scmp.ne.s32.totalorder %s594_s19, %s369_s28  ;;  %p371_p3 = pneg %p596_p11 }
  0x33   : > { %p375_p10 = scmp.lt.u32.totalorder %s594_s19, %s690_s0  ;;  %p376_p1 = scmp.lt.u32.totalorder %s374_s3, %s369_s28 }
  0x34   : > { %p372_p5 = pnand %p371_p3, %p370_p0  ;;  %p378_p4 = scmp.lt.u32.totalorder %s369_s28, %s594_s19 }
  0x35   : > { %p377_p2 = por %p376_p1, %p375_p10 }
  0x36   : > { %p373_p7 = pneg %p372_p5 }
  0x37   : > { %p379_p6 = por %p378_p4, %p377_p2 }
  0x39   : > { %p380_p9 = pnand %p379_p6, %p373_p7 }
  0x3b   : > { %383 = shalt.err (!%p380_p9)
}
  0x3c   : > { %s384_s6 = scalar_lea.vmem %s600_s24, 128  ;;  %s472_s14 = smov [#allocation2]  }
  0x3d   : > { %p385_p12 = scmp.ne.s32.totalorder %s600_s24, %s384_s6  ;;  %s389_s18 = sshll.u32 %s472_s14, 4  ;;  %s390_s18 = int_to_ptr.vmem [resolvable:$false] %s389_s18 }
  0x3e   : > { %s391_s21 = scalar_lea.vmem %s390_s18, 256  ;;  %p392_p5 = scmp.lt.s32.totalorder %s600_s24, %s390_s18 }
  0x3f   : > { %p387_p13 = pnand %p385_p12, %p371_p3  ;;  %p393_p10 = scmp.lt.s32.totalorder %s391_s21, %s384_s6 }
  0x41   : > { %p388_p0 = pneg %p387_p13  ;;  %p394_p1 = por %p393_p10, %p392_p5 }
  0x43   : > { %p395_p2 = pnand %p394_p1, %p388_p0 }
  0x45   : > { %398 = shalt.err (!%p395_p2)
}
  0x46   : > { %299 = dma.hbm_to_vmem [thread:$0]  (!%p596_p11), %s594_s19, 128, %s600_s24, %s122_s27  }
  0x47   : > { %p707_p7 = scmp.ne.s32.totalorder %s698_s17, 0 }
  0x48   : > { %s630_s22 = sand.u32 (!%p707_p7), 1, %s461_s10   ;;  %p708_p3 = scmp.ne.s32.totalorder (!%p707_p7), %s696_s15, 0 }
  0x49   : > { %141 = sbr.rel (%p707_p7) target bundleno = 109 (0x6d), region = 28  ;;  %s277_s25 = sshll.u32 (!%p707_p7), %s630_s22, 3 }
  0x4a   : > { %s144_s23 = scalar_lea.sflag (!%p707_p7), [#allocation3], %s630_s22  ;;  %s147_s28 = scalar_lea.vmem (!%p707_p7), [#allocation2], %s277_s25 }
  0x50   : > { %444 = dma.done.wait (%p708_p3), %s144_s23, 128  }
  0x51   : > { %446 = vsyncadd (%p708_p3), %s144_s23, 4294967168  ;;  %p709_p4 = scmp.eq.s32.totalorder %s510_s13, 0 }
  0x53   : > { %448 = dma.done.wait (%p709_p4), [#allocation6], 128   ;;  %p710_p11 = pmov %p709_p4 }
  0x54   : > { %s171_s17 = scalar_lea.vmem [#allocation7], %s277_s25  ;;  %s281_s24 = sshll.u32 %s510_s13, 7  ;;  %v172_v0 = vld [vmem:[%s147_s28] sm:$0xff]  ;;  %v173_v1 = vld [vmem:[#allocation5] sm:$0xff] }
  0x55   : > { %450 = vsyncadd (%p710_p11), [#allocation6], 4294967168  ;;  %s190_s19 = sshll.u32 %s171_s17, 4  ;;  %v174_v2 = vadd.f32 %v173_v1, %v172_v0  ;;  %s648_s27 = scalar_lea.hbm %s692_s2, %s281_s24  ;;  %s643_s19 = int_to_ptr.vmem [resolvable:$true] %s190_s19 }
  0x56   : > { %s177_s29 = scalar_lea.sflag [#allocation4], %s630_s22  ;;  %s399_s30 = scalar_lea.vmem %s643_s19, 128 }
  0x57   : > { %175 = vst [vmem:[%s171_s17] sm:$0xff] %v174_v2  ;;  %p400_p6 = scmp.ne.s32.totalorder %s643_s19, %s399_s30  ;;  %s473_s13 = smov [#allocation7]  }
  0x58   : > { %s403_s3 = sshll.u32 %s473_s13, 4  ;;  %s404_s3 = int_to_ptr.vmem [resolvable:$false] %s403_s3 }
  0x59   : > { %p401_p9 = pnand %p400_p6, %p581_p8  ;;  %s405_s4 = scalar_lea.vmem %s404_s3, 256 }
  0x5a   : > { %p406_p13 = scmp.lt.s32.totalorder %s643_s19, %s404_s3  ;;  %p407_p0 = scmp.lt.s32.totalorder %s405_s4, %s399_s30 }
  0x5b   : > { %p402_p12 = pneg %p401_p9 }
  0x5c   : > { %p408_p5 = por %p407_p0, %p406_p13 }
  0x5e   : > { %p409_p10 = pnand %p408_p5, %p402_p12 }
  0x60   : > { %412 = shalt.err (!%p409_p10)
}
  0x61   : > { %s413_s5 = scalar_lea.hbm %s648_s27, 128  ;;  %s417_s18 = scalar_lea.hbm %s692_s2, 256 }
  0x62   : > { %p414_p1 = scmp.ne.s32.totalorder %s648_s27, %s413_s5  ;;  %p418_p3 = scmp.lt.u32.totalorder %s648_s27, %s692_s2 }
  0x63   : > { %p419_p4 = scmp.lt.u32.totalorder %s417_s18, %s413_s5  ;;  %p421_p6 = scmp.lt.u32.totalorder %s413_s5, %s648_s27 }
  0x64   : > { %p415_p2 = pnand %p414_p1, %p581_p8 }
  0x65   : > { %p420_p11 = por %p419_p4, %p418_p3 }
  0x66   : > { %p416_p7 = pneg %p415_p2 }
  0x67   : > { %p422_p9 = por %p421_p6, %p420_p11 }
  0x69   : > { %p423_p12 = pnand %p422_p9, %p416_p7 }
  0x6b   : > { %426 = shalt.err (!%p423_p12)
}
  0x6c   : > { %290 = dma.vmem_to_hbm [thread:$0]  (%p581_p8), %s643_s19, 128, %s648_s27, %s177_s29  }
  0x6d PF: > { %s202_s25 = sand.u32 1, %s457_s9   ;;  %p711_p13 = scmp.ne.s32.totalorder %s697_s16, 0 }
  0x6e   : > { %p712_p0 = scmp.ge.s32.totalorder %s469_s12, 2  ;;  %s203_s23 = scalar_lea.sflag [#allocation4], %s202_s25 }
  0x70   : > { %p301_p5 = pnand %p712_p0, %p711_p13 }
  0x72   : > { %452 = dma.done.wait (!%p301_p5), %s203_s23, 128  }
  0x73   : > { %454 = vsyncadd (!%p301_p5), %s203_s23, 4294967168  ;;  %p16_p10 = scmp.ge.s32.totalorder %s537_s20, 4   ;;  %s713_s9 = smov %s461_s10 }
  0x74   : > { %s714_s10 = smov %s465_s11  ;;  %s715_s11 = smov %s573_s7 }
  0x75   : > { %s716_s12 = smov %s537_s20  ;;  %18 = sbr.rel (!%p16_p10) target bundleno = 6 (0x6), region = 77 }
  0x7c   :  { %208 = vsyncpa [#allocation3], 1 }
  0x7d   :  { %210 = vsyncpa [#allocation3 + $0x1], 1 }
  0x7e   :  { %211 = vsyncpa [#allocation6], 1 }
  0x7f   :  { %212 = vsyncpa [#allocation4], 1 }
  0x80   :  { %214 = vsyncpa [#allocation4 + $0x1], 1 }

// kernel: _mlp_forward_impl.1
= control target key start
LH: loop header
LB: loop body
LE: loop exit
PB: predicated region body
PF: predicated region fallthrough
CT: control target
= control target key end

     0   :  { %11 = vsyncpa [#allocation3], 0  ;;  %s798_s0 = inlined_call_operand.hbm [shape: f32[8,16], index: 0, kind: input, shape index: {}]   ;;  %s799_s1 = inlined_call_operand.hbm [shape: f32[16,128], index: 1, kind: input, shape index: {}]   ;;  %s800_s2 = inlined_call_operand.vmem [shape: f32[1,128], index: 2, kind: input, shape index: {}]   ;;  %s801_s3 = inlined_call_operand.hbm [shape: f32[128,128], index: 3, kind: input, shape index: {}]   ;;  %s802_s4 = inlined_call_operand.vmem [shape: f32[1,128], index: 4, kind: input, shape index: {}]   ;;  %s803_s5 = inlined_call_operand.hbm [shape: f32[128,128], index: 5, kind: input, shape index: {}]   ;;  %s804_s6 = inlined_call_operand.hbm [shape: f32[8,128], index: 6, kind: output, shape index: {}]  }
   0x1   :  { %12 = vsyncpa [#allocation6], 0 }
   0x2   :  { %13 = vsyncpa [#allocation9], 0 }
   0x3   :  { %14 = vsyncpa [#allocation4], 0  ;;  %s658_s21 = smov [#allocation5]   ;;  %s540_s25 = scalar_lea.hbm %s799_s1, 256 }
   0x4   :  { %s30_s22 = sshll.u32 %s658_s21, 4  ;;  %p541_p0 = scmp.ne.s32.totalorder %s799_s1, %s540_s25  ;;  %s31_s22 = int_to_ptr.vmem [resolvable:$true] %s30_s22 }
   0x5   :  { %p544_p1 = scmp.lt.u32.totalorder %s540_s25, %s799_s1 }
   0x7   :  { %p546_p2 = pnand %p544_p1, %p541_p0 }
   0x9   :  { %549 = shalt.err (!%p546_p2)
}
   0xa   :  { %s550_s30 = scalar_lea.vmem %s31_s22, 256  ;;  %p555_p4 = scmp.lt.s32.totalorder %s31_s22, %s31_s22 }
   0xb   :  { %p551_p3 = scmp.ne.s32.totalorder %s31_s22, %s550_s30  ;;  %p556_p5 = scmp.lt.s32.totalorder %s550_s30, %s550_s30 }
   0xd   :  { %p557_p6 = por %p556_p5, %p555_p4 }
   0xf   :  { %p558_p7 = pnand %p557_p6, %p551_p3 }
  0x11   :  { %561 = shalt.err (!%p558_p7)
}
  0x12   :  { %s659_s7 = smov 128   ;;  %s660_s8 = smov 8  }
  0x13   :  { %36 = dma.hbm_to_vmem [thread:$0]  %s799_s1, 256, %s31_s22, [#allocation6], %s659_s7, %s659_s7, %s660_s8  }
  0x14   :  { %s661_s11 = smov [#allocation2]   ;;  %s662_s13 = smov [#allocation7]  }
  0x15   :  { %s21_s12 = sshll.u32 %s661_s11, 4  ;;  %s44_s14 = sshll.u32 %s662_s13, 4  ;;  %s22_s12 = int_to_ptr.vmem [resolvable:$true] %s21_s12  ;;  %s45_s14 = int_to_ptr.vmem [resolvable:$true] %s44_s14 }
  0x16   :  { %s562_s17 = scalar_lea.hbm %s798_s0, 128 }
  0x17   :  { %p563_p8 = scmp.ne.s32.totalorder %s798_s0, %s562_s17  ;;  %p566_p9 = scmp.lt.u32.totalorder %s562_s17, %s798_s0 }
  0x19   :  { %p568_p10 = pnand %p566_p9, %p563_p8 }
  0x1b   :  { %571 = shalt.err (!%p568_p10)
}
  0x1c   :  { %s572_s1 = scalar_lea.vmem %s22_s12, 128  ;;  %p577_p12 = scmp.lt.s32.totalorder %s22_s12, %s22_s12 }
  0x1d   :  { %p573_p11 = scmp.ne.s32.totalorder %s22_s12, %s572_s1  ;;  %p578_p13 = scmp.lt.s32.totalorder %s572_s1, %s572_s1 }
  0x1f   :  { %p579_p0 = por %p578_p13, %p577_p12 }
  0x21   :  { %p580_p1 = pnand %p579_p0, %p573_p11 }
  0x23   :  { %583 = shalt.err (!%p580_p1)
}
  0x24   :  { %24 = dma.hbm_to_vmem [thread:$0]  %s798_s0, 128, %s22_s12, [#allocation3]  }
  0x25   :  { %s584_s26 = scalar_lea.hbm %s801_s3, 2048 }
  0x26   :  { %p585_p2 = scmp.ne.s32.totalorder %s801_s3, %s584_s26  ;;  %p588_p3 = scmp.lt.u32.totalorder %s584_s26, %s801_s3 }
  0x28   :  { %p590_p4 = pnand %p588_p3, %p585_p2 }
  0x2a   :  { %593 = shalt.err (!%p590_p4)
}
  0x2b   :  { %s594_s9 = scalar_lea.vmem %s45_s14, 2048  ;;  %p599_p6 = scmp.lt.s32.totalorder %s45_s14, %s45_s14 }
  0x2c   :  { %p595_p5 = scmp.ne.s32.totalorder %s45_s14, %s594_s9  ;;  %p600_p7 = scmp.lt.s32.totalorder %s594_s9, %s594_s9 }
  0x2e   :  { %p601_p8 = por %p600_p7, %p599_p6 }
  0x30   :  { %p602_p9 = pnand %p601_p8, %p595_p5 }
  0x32   :  { %605 = shalt.err (!%p602_p9)
}
  0x33   :  { %50 = dma.hbm_to_vmem [thread:$0]  %s801_s3, 2048, %s45_s14, [#allocation6], %s659_s7, %s659_s7, %s660_s8  }
  0x34   :  { %s663_s11 = smov [#allocation8]   ;;  %s606_s16 = scalar_lea.hbm %s803_s5, 2048 }
  0x35   :  { %s58_s12 = sshll.u32 %s663_s11, 4  ;;  %p607_p10 = scmp.ne.s32.totalorder %s803_s5, %s606_s16  ;;  %s59_s12 = int_to_ptr.vmem [resolvable:$true] %s58_s12 }
  0x36   :  { %p610_p11 = scmp.lt.u32.totalorder %s606_s16, %s803_s5 }
  0x38   :  { %p612_p12 = pnand %p610_p11, %p607_p10 }
  0x3a   :  { %615 = shalt.err (!%p612_p12)
}
  0x3b   :  { %s616_s21 = scalar_lea.vmem %s59_s12, 2048  ;;  %p621_p0 = scmp.lt.s32.totalorder %s59_s12, %s59_s12 }
  0x3c   :  { %p617_p13 = scmp.ne.s32.totalorder %s59_s12, %s616_s21  ;;  %p622_p1 = scmp.lt.s32.totalorder %s616_s21, %s616_s21 }
  0x3e   :  { %p623_p2 = por %p622_p1, %p621_p0 }
  0x40   :  { %p624_p3 = pnand %p623_p2, %p617_p13 }
  0x42   :  { %627 = shalt.err (!%p624_p3)
}
  0x43   :  { %64 = dma.hbm_to_vmem [thread:$0]  %s803_s5, 2048, %s59_s12, [#allocation9], %s659_s7, %s659_s7, %s660_s8  }
  0x44   :  { %650 = dma.done.wait [#allocation3], 128  }
  0x45   :  { %651 = vsyncadd [#allocation3], 4294967168 }
  0x46   :  { %652 = dma.done.wait [#allocation6], 2304  }
  0x47   :  { %653 = vsyncadd [#allocation6], 4294964992 }
  0x48   :  { %654 = dma.done.wait [#allocation9], 2048  }
  0x49   :  { %655 = vsyncadd [#allocation9], 4294965248  ;;  %v664_v0 = vmov 0.0|0.0   ;;  %vm665_vm0 = vmmov 0   ;;  %v666_v1 = vmov 0.0   ;;  %v78_v2 = vld [vmem:[#allocation5] sm:$0xff] }
  0x4a   :  { %479 = vmatprep.subr.bf16.mxu0 %v664_v0  ;;  %406 = vmatprep.mubr.msk.f32.mxu0 %vm665_vm0, %v666_v1  ;;  %v79_v3 = vld [vmem:[#allocation5 + $0x8] sm:$0xff]  ;;  %v163_v5 = vld [vmem:[#allocation7] sm:$0xff]  ;;  %v164_v6 = vld [vmem:[#allocation7 + $0x8] sm:$0xff]  ;;  %vm87_vm1 = vcmask 130048  }
  0x4b   :  { %482 = vmatprep.subr.bf16.mxu1 %v664_v0  ;;  %441 = vmatprep.mubr.msk.f32.mxu1 %vm665_vm0, %v666_v1  ;;  %v480_v4 = vpack.c.bf16 %v79_v3, %v78_v2  ;;  %v165_v7 = vld [vmem:[#allocation7 + $0x10] sm:$0xff]  ;;  %v483_v8 = vpack.c.bf16 %v164_v6, %v163_v5  ;;  %v166_v9 = vld [vmem:[#allocation7 + $0x18] sm:$0xff]  ;;  %v77_v10 = vld [vmem:[#allocation2] sm:$0xff] }
  0x4c   :  { %v486_v11 = vpack.c.bf16 %v166_v9, %v165_v7  ;;  %v167_v12 = vld [vmem:[#allocation7 + $0x20] sm:$0xff]  ;;  %v168_v13 = vld [vmem:[#allocation7 + $0x28] sm:$0xff]  ;;  %v169_v15 = vld [vmem:[#allocation7 + $0x30] sm:$0xff] }
  0x4d   :  { %481 = vmatpush3.bf16.msra.mxu0 %v480_v4  ;;  %484 = vmatpush3.bf16.msra.mxu1 %v483_v8  ;;  %v489_v14 = vpack.c.bf16 %v168_v13, %v167_v12  ;;  %v170_v16 = vld [vmem:[#allocation7 + $0x38] sm:$0xff]  ;;  %v171_v18 = vld [vmem:[#allocation7 + $0x40] sm:$0xff]  ;;  %v172_v19 = vld [vmem:[#allocation7 + $0x48] sm:$0xff] }
  0x4e   :  { %506 = vmatprep.subr.bf16.mxu0 %v664_v0  ;;  %485 = vmatprep.subr.bf16.mxu1 %v664_v0  ;;  %v492_v17 = vpack.c.bf16 %v170_v16, %v169_v15  ;;  %v495_v20 = vpack.c.bf16 %v172_v19, %v171_v18  ;;  %v173_v21 = vld [vmem:[#allocation7 + $0x50] sm:$0xff]  ;;  %v174_v22 = vld [vmem:[#allocation7 + $0x58] sm:$0xff]  ;;  %v175_v24 = vld [vmem:[#allocation7 + $0x60] sm:$0xff] }
  0x4f   :  { %v498_v23 = vpack.c.bf16 %v174_v22, %v173_v21  ;;  %v176_v25 = vld [vmem:[#allocation7 + $0x68] sm:$0xff]  ;;  %v177_v27 = vld [vmem:[#allocation7 + $0x70] sm:$0xff]  ;;  %v178_v28 = vld [vmem:[#allocation7 + $0x78] sm:$0xff] }
  0x50   :  { %407 = vmatmul.mubr.msk.f32.vlgmr.msra.gmra.mrb[0].mxu0 %vm87_vm1, %v77_v10  ;;  %v501_v26 = vpack.c.bf16 %v176_v25, %v175_v24  ;;  %v504_v29 = vpack.c.bf16 %v178_v28, %v177_v27  ;;  %v258_v30 = vld [vmem:[#allocation8] sm:$0xff]  ;;  %v259_v31 = vld [vmem:[#allocation8 + $0x8] sm:$0xff]  ;;  %v260_v32 = vld [vmem:[#allocation8 + $0x10] sm:$0xff] }
  0x51   :  { %476 = vmatprep.mubr.msk.f32.mxu0 %vm665_vm0, %v666_v1  ;;  %487 = vmatpush3.bf16.msra.mxu1 %v486_v11  ;;  %v507_v33 = vpack.c.bf16 %v259_v31, %v258_v30  ;;  %v261_v34 = vld [vmem:[#allocation8 + $0x18] sm:$0xff]  ;;  %v262_v36 = vld [vmem:[#allocation8 + $0x20] sm:$0xff]  ;;  %v263_v37 = vld [vmem:[#allocation8 + $0x28] sm:$0xff] }
  0x52   :  { %488 = vmatprep.subr.bf16.mxu1 %v664_v0  ;;  %v510_v35 = vpack.c.bf16 %v261_v34, %v260_v32  ;;  %v513_v38 = vpack.c.bf16 %v263_v37, %v262_v36  ;;  %v264_v39 = vld [vmem:[#allocation8 + $0x30] sm:$0xff]  ;;  %v265_v40 = vld [vmem:[#allocation8 + $0x38] sm:$0xff]  ;;  %v266_v42 = vld [vmem:[#allocation8 + $0x40] sm:$0xff] }
  0x53   :  { %508 = vmatpush3.bf16.msra.mxu0 %v507_v33  ;;  %v516_v41 = vpack.c.bf16 %v265_v40, %v264_v39  ;;  %v267_v43 = vld [vmem:[#allocation8 + $0x48] sm:$0xff]  ;;  %v268_v45 = vld [vmem:[#allocation8 + $0x50] sm:$0xff]  ;;  %v269_v46 = vld [vmem:[#allocation8 + $0x58] sm:$0xff] }
  0x54   :  { %509 = vmatprep.subr.bf16.mxu0 %v664_v0  ;;  %v519_v44 = vpack.c.bf16 %v267_v43, %v266_v42  ;;  %v522_v47 = vpack.c.bf16 %v269_v46, %v268_v45  ;;  %v362_v48 = vld [vmem:[%s800_s2] ss:$0 sm:$0xff]  ;;  %v270_v54 = vld [vmem:[#allocation8 + $0x60] sm:$0xff]  ;;  %v272_v57 = vld [vmem:[#allocation8 + $0x70] sm:$0xff]  ;;  %s667_s2 = smov [#allocation10]  }
  0x55   :  { %490 = vmatpush3.bf16.msra.mxu1 %v489_v14  ;;  %v271_v55 = vld [vmem:[#allocation8 + $0x68] sm:$0xff]  ;;  %v273_v58 = vld [vmem:[#allocation8 + $0x78] sm:$0xff]  ;;  %s351_s22 = sshll.u32 %s667_s2, 4  ;;  %s352_s22 = int_to_ptr.vmem [resolvable:$true] %s351_s22 }
  0x56   :  { %491 = vmatprep.subr.bf16.mxu1 %v664_v0  ;;  %v525_v56 = vpack.c.bf16 %v271_v55, %v270_v54  ;;  %v528_v59 = vpack.c.bf16 %v273_v58, %v272_v57  ;;  %v364_v60 = vld [vmem:[%s802_s4] ss:$0 sm:$0xff]  ;;  %s628_s23 = scalar_lea.vmem %s352_s22, 128  ;;  %p633_p5 = scmp.lt.s32.totalorder %s352_s22, %s352_s22 }
  0x57   :  { %511 = vmatpush3.bf16.msra.mxu0 %v510_v35  ;;  %p629_p4 = scmp.ne.s32.totalorder %s352_s22, %s628_s23  ;;  %p634_p6 = scmp.lt.s32.totalorder %s628_s23, %s628_s23 }
  0x58   :  { %512 = vmatprep.subr.bf16.mxu0 %v664_v0 }
  0x59   :  { %493 = vmatpush3.bf16.msra.mxu1 %v492_v17  ;;  %p635_p7 = por %p634_p6, %p633_p5 }
  0x5a   :  { %494 = vmatprep.subr.bf16.mxu1 %v664_v0 }
  0x5b   :  { %514 = vmatpush3.bf16.msra.mxu0 %v513_v38  ;;  %p636_p8 = pnand %p635_p7, %p629_p4 }
  0x5c   :  { %515 = vmatprep.subr.bf16.mxu0 %v664_v0 }
  0x5d   :  { %496 = vmatpush3.bf16.msra.mxu1 %v495_v20 }
  0x5e   :  { %497 = vmatprep.subr.bf16.mxu1 %v664_v0 }
  0x5f   :  { %517 = vmatpush3.bf16.msra.mxu0 %v516_v41 }
  0x60   :  { %518 = vmatprep.subr.bf16.mxu0 %v664_v0 }
  0x61   :  { %499 = vmatpush3.bf16.msra.mxu1 %v498_v23 }
  0x62   :  { %500 = vmatprep.subr.bf16.mxu1 %v664_v0 }
  0x63   :  { %520 = vmatpush3.bf16.msra.mxu0 %v519_v44 }
  0x64   :  { %521 = vmatprep.subr.bf16.mxu0 %v664_v0 }
  0x65   :  { %502 = vmatpush3.bf16.msra.mxu1 %v501_v26 }
  0x66   :  { %503 = vmatprep.subr.bf16.mxu1 %v664_v0 }
  0x67   :  { %523 = vmatpush3.bf16.msra.mxu0 %v522_v47 }
  0x68   :  { %524 = vmatprep.subr.bf16.mxu0 %v664_v0 }
  0x69   :  { %505 = vmatpush3.bf16.msra.mxu1 %v504_v29 }
  0x6b   :  { %526 = vmatpush3.bf16.msra.mxu0 %v525_v56 }
  0x6c   :  { %527 = vmatprep.subr.bf16.mxu0 %v664_v0 }
  0x6f   :  { %529 = vmatpush3.bf16.msra.mxu0 %v528_v59 }
 0x123   :  { %v157_v49 = vpop.f32.mrb[0].mxu0 }
 0x124   :  { %v158_v50 = vadd.f32 %v362_v48, %v157_v49  ;;  %v408_v51 = vpop.f32.mrb[1].mxu0 }
 0x126   :  { %v161_v52 = vmul.f32 0.01, %v158_v50 }
 0x128   :  { %v162_v53 = vmax.f32 %v158_v50, %v161_v52 }
 0x12a   :  { %442 = vmatmul.mubr.f32.vlgmr.msra.gmra.mrb[0].mxu1 %v162_v53 }
 0x1fd   :  { %v252_v61 = vpop.f32.mrb[0].mxu1 }
 0x1fe   :  { %v253_v62 = vadd.f32 %v364_v60, %v252_v61  ;;  %v443_v63 = vpop.f32.mrb[1].mxu1 }
 0x200   :  { %v256_v1 = vmul.f32 0.01, %v253_v62 }
 0x202   :  { %v257_v2 = vmax.f32 %v253_v62, %v256_v1 }
 0x204   :  { %477 = vmatmul.mubr.f32.vlgmr.msra.gmra.mrb[2].mxu0 %v257_v2 }
 0x2d7   :  { %v340_v3 = vpop.f32.mrb[2].mxu0 }
 0x2d8   :  { %344 = vst [vmem:[#allocation10] sm:$0xff] %v340_v3  ;;  %v478_v0 = vpop.f32.mrb[3].mxu0 }
 0x2d9   :  { %639 = shalt.err (!%p636_p8)
}
 0x2da   :  { %s640_s25 = scalar_lea.hbm %s804_s6, 128 }
 0x2db   :  { %p641_p9 = scmp.ne.s32.totalorder %s804_s6, %s640_s25  ;;  %p644_p10 = scmp.lt.u32.totalorder %s640_s25, %s804_s6 }
 0x2dd   :  { %p646_p11 = pnand %p644_p10, %p641_p9 }
 0x2df   :  { %649 = shalt.err (!%p646_p11)
}
 0x2e0   :  { %354 = dma.vmem_to_hbm [thread:$0]  %s352_s22, 128, %s804_s6, [#allocation4]  }
 0x2e1   :  { %656 = dma.done.wait [#allocation4], 128  }
 0x2e2   :  { %657 = vsyncadd [#allocation4], 4294967168 }
 0x2e3   :  { %358 = vsyncpa [#allocation3], 1 }
 0x2e4   :  { %359 = vsyncpa [#allocation6], 1 }
 0x2e5   :  { %360 = vsyncpa [#allocation9], 1 }
 0x2e6   :  { %361 = vsyncpa [#allocation4], 1 }

</bundles_post_ra>
